<compile_context>
chip_gen: v5e
topology: v5e:2x2
jax: 0.10.0
libtpu: 0.0.40
codegen_flags: <defaults>
</compile_context>

<pallas_src>
import jax
import jax.numpy as jnp
from jax import lax
from jax.experimental import pallas as pl
from jax.experimental.pallas import tpu as pltpu

LN_EPS = 1e-5  # torch.nn.LayerNorm default


def _round_up(v, m):
    return ((v + m - 1) // m) * m


# ---------------------------------------------------------------------------
# Kernel
# ---------------------------------------------------------------------------
def _linear_head_kernel(x_ref, w_ref, b_ref, o_ref):
    # x_ref: (TM, C)   row tile
    # w_ref: (C, TN)   gamma-folded, class-padded weight tile
    # b_ref: (1, TN)   beta-folded, class-padded bias tile
    # o_ref: (TM, TN)
    xf = x_ref[...].astype(jnp.float32)
    c_inv = 1.0 / x_ref.shape[-1]

    # One-pass LayerNorm statistics in f32 (biased variance, matches torch).
    mean = jnp.sum(xf, axis=-1, keepdims=True) * c_inv
    mean_sq = jnp.sum(xf * xf, axis=-1, keepdims=True) * c_inv
    var = jnp.maximum(mean_sq - mean * mean, 0.0)
    inv = lax.rsqrt(var + LN_EPS)
    xn = (xf - mean) * inv  # gamma/beta already folded into w/b

    out = jnp.dot(xn.astype(w_ref.dtype), w_ref[...],
                  preferred_element_type=jnp.float32)
    out = out + b_ref[...].astype(jnp.float32)
    o_ref[...] = out.astype(o_ref.dtype)


# ---------------------------------------------------------------------------
# Parameter preparation (hoist to load time in a real model)
# ---------------------------------------------------------------------------
def prepare_linear_head_params(gamma, beta, weight, bias, *, mxu_dtype=None):
    """Fold LayerNorm affine into the Linear weight/bias and pad classes to 128.

    weight: (num_classes, in_channels) torch layout.
    Returns (w_folded (C, NC_pad), b_folded (1, NC_pad) f32, num_classes).
    """
    num_classes, in_channels = weight.shape
    nc_pad = _round_up(num_classes, 128)
    w_dtype = mxu_dtype if mxu_dtype is not None else weight.dtype

    g = gamma.astype(jnp.float32)
    b = beta.astype(jnp.float32)
    w = weight.astype(jnp.float32)
    c = bias.astype(jnp.float32)

    w_folded = g[:, None] * w.T                       # (C, NC)
    b_folded = b[None, :] @ w.T + c[None, :]          # (1, NC)

    if nc_pad != num_classes:                         # skip padding when aligned
        w_folded = jnp.zeros((in_channels, nc_pad), jnp.float32
                             ).at[:, :num_classes].set(w_folded)
        b_folded = jnp.zeros((1, nc_pad), jnp.float32
                             ).at[:, :num_classes].set(b_folded)

    return w_folded.astype(w_dtype), b_folded, num_classes


# ---------------------------------------------------------------------------
# Tile / VMEM budget derivation
# ---------------------------------------------------------------------------
def _estimate_vmem(tm, tn, c, nc_pad, n_rows, x_item, w_item, o_item):
    nri = pl.cdiv(n_rows, tm)
    ncj = pl.cdiv(nc_pad, tn)
    nbuf_x = 1 if nri == 1 else 2
    nbuf_w = 1 if ncj == 1 else 2
    return (nbuf_x * tm * c * x_item          # x tile buffers
            + nbuf_w * c * tn * w_item        # weight tile buffers
            + nbuf_w * tn * 4                 # bias tile buffers
            + 2 * tm * tn * o_item            # output tile buffers
            + 2 * tm * c * 4                  # f32 xf / xn temporaries
            + tm * tn * 4)                    # f32 matmul accumulator


def _derive_tiles(n_rows, c, nc_pad, x_item, w_item, o_item,
                  tile_m, tile_n, budget):
    tm = max(8, min(_round_up(int(tile_m), 8), _round_up(n_rows, 8)))
    tn = max(128, min(_round_up(int(tile_n), 128), nc_pad))
    # Shrink rows first (keeps the lane-dense output slab wide), then classes.
    while _estimate_vmem(tm, tn, c, nc_pad, n_rows, x_item, w_item, o_item) > budget and tm > 8:
        tm = max(8, _round_up(tm // 2, 8))
    while _estimate_vmem(tm, tn, c, nc_pad, n_rows, x_item, w_item, o_item) > budget and tn > 128:
        tn = max(128, _round_up(tn // 2, 128))
    # v7x megacore: ensure >=2 grid steps so both TensorCores get work.
    if pl.cdiv(n_rows, tm) * pl.cdiv(nc_pad, tn) < 2 and n_rows > 8:
        tm = max(8, _round_up(pl.cdiv(n_rows, 2), 8))
    return tm, tn


# ---------------------------------------------------------------------------
# Pallas call
# ---------------------------------------------------------------------------
def linear_head_apply(x, w_folded, b_folded, num_classes, *,
                      tile_m=512, tile_n=512, vmem_budget_bytes=40 << 20):
    """x: (..., C). w_folded: (C, NC_pad). Returns (..., num_classes)."""
    in_channels = x.shape[-1]
    lead_shape = x.shape[:-1]
    x2 = x.reshape(-1, in_channels)
    n_rows = x2.shape[0]
    nc_pad = w_folded.shape[1]

    x_item = jnp.dtype(x.dtype).itemsize
    w_item = jnp.dtype(w_folded.dtype).itemsize
    o_item = x_item

    tm, tn = _derive_tiles(n_rows, in_channels, nc_pad, x_item, w_item, o_item,
                           tile_m, tile_n, vmem_budget_bytes)
    nri = pl.cdiv(n_rows, tm)
    ncj = pl.cdiv(nc_pad, tn)

    est_vmem = _estimate_vmem(tm, tn, in_channels, nc_pad, n_rows,
                              x_item, w_item, o_item)
    vmem_limit = int(min(max(2 * est_vmem, 32 << 20), 56 << 20))

    w_fetches = 1 if ncj == 1 else nri  # weight stays resident when not class-tiled
    cost = pl.CostEstimate(
        flops=2 * n_rows * in_channels * nc_pad,
        transcendentals=n_rows * ncj,
        bytes_accessed=(n_rows * in_channels * x_item
                        + n_rows * nc_pad * o_item
                        + w_fetches * in_channels * nc_pad * w_item
                        + nc_pad * 4),
    )

    def run(single_buffer):
        def spec(shape, imap, invariant):
            if single_buffer and invariant:
                return pl.BlockSpec(shape, imap, pipeline_mode=pl.Buffered(1))
            return pl.BlockSpec(shape, imap)

        grid_spec = pltpu.PrefetchScalarGridSpec(
            num_scalar_prefetch=0,
            grid=(nri, ncj),  # classes innermost: x tile is reused across class tiles
            in_specs=[
                spec((tm, in_channels), lambda i, j: (i, 0), nri == 1),
                spec((in_channels, tn), lambda i, j: (0, j), ncj == 1),
                spec((1, tn), lambda i, j: (0, j), ncj == 1),
            ],
            out_specs=pl.BlockSpec((tm, tn), lambda i, j: (i, j)),
        )
        return pl.pallas_call(
            _linear_head_kernel,
            out_shape=jax.ShapeDtypeStruct((n_rows, nc_pad), x.dtype),
            grid_spec=grid_spec,
            compiler_params=pltpu.CompilerParams(
                dimension_semantics=("parallel", "parallel"),
                vmem_limit_bytes=vmem_limit),
            cost_estimate=cost,
        )(x2, w_folded, b_folded)

    try:
        out = run(single_buffer=True)
    except Exception:  # fallback if single-buffer pipeline_mode is unsupported
        out = run(single_buffer=False)

    if nc_pad != num_classes:
        out = out[:, :num_classes]
    return out.reshape(*lead_shape, num_classes)


def linear_head_forward(x, gamma, beta, weight, bias, *,
                        tile_m=512, tile_n=512, mxu_dtype=None,
                        vmem_budget_bytes=40 << 20):
    """LinearHead.forward: LayerNorm(in_channels) -> Linear(in_channels, num_classes)."""
    # NOTE: in a real model, call prepare_linear_head_params once at load time and
    # reuse (w_folded, b_folded); re-folding per call is avoidable HBM traffic.
    w_folded, b_folded, num_classes = prepare_linear_head_params(
        gamma, beta, weight, bias, mxu_dtype=mxu_dtype)
    return linear_head_apply(x, w_folded, b_folded, num_classes,
                             tile_m=tile_m, tile_n=tile_n,
                             vmem_budget_bytes=vmem_budget_bytes)


# ---------------------------------------------------------------------------
# Reference + test
# ---------------------------------------------------------------------------
def _reference(x, gamma, beta, weight, bias):
    xf = x.astype(jnp.float32)
    mean = jnp.mean(xf, axis=-1, keepdims=True)
    var = jnp.mean((xf - mean) ** 2, axis=-1, keepdims=True)
    xn = (xf - mean) / jnp.sqrt(var + LN_EPS) * gamma + beta
    return (xn @ weight.T.astype(jnp.float32) + bias).astype(x.dtype)


if __name__ == "__main__":
    # Small shapes consistent with the module: batch=2, seq=8, in_channels=512, num_classes=2.
    batch, seq, in_channels, num_classes = 2, 8, 512, 2

    key = jax.random.PRNGKey(0)
    kx, kg, kb, kw, kbias = jax.random.split(key, 5)

    x = jax.random.normal(kx, (batch, seq, in_channels), dtype=jnp.float32)

    # Deterministic synthetic parameters (shapes match nn.LayerNorm / nn.Linear).
    gamma = 1.0 + 0.1 * jax.random.normal(kg, (in_channels,), dtype=jnp.float32)
    beta = 0.1 * jax.random.normal(kb, (in_channels,), dtype=jnp.float32)
    weight = 0.05 * jax.random.normal(kw, (num_classes, in_channels), dtype=jnp.float32)
    bias = 0.05 * jax.random.normal(kbias, (num_classes,), dtype=jnp.float32)

    out = linear_head_forward(x, gamma, beta, weight, bias)
    out = jax.block_until_ready(out)

    ref = _reference(x, gamma, beta, weight, bias)
    assert out.shape == (batch, seq, num_classes), out.shape
    err = float(jnp.max(jnp.abs(out.astype(jnp.float32) - ref.astype(jnp.float32))))
    assert jnp.allclose(out, ref, atol=1e-4, rtol=1e-4), err

    # TODO(synk): parse_losses / build_loss depend on an external loss registry; only forward() is implemented.
    print("KERNEL_OK")
</pallas_src>

<mosaic_0001>
module attributes {stable_mosaic.version = 11 : i64} {
  func.func @_linear_head_kernel(%arg0: i32, %arg1: i32, %arg2: memref<8x512xf32, #tpu.memory_space<vmem>>, %arg3: memref<512x128xf32, #tpu.memory_space<vmem>>, %arg4: memref<1x128xf32, #tpu.memory_space<vmem>>, %arg5: memref<8x128xf32, #tpu.memory_space<vmem>>) attributes {dimension_semantics = [#tpu.dimension_semantics<parallel>, #tpu.dimension_semantics<parallel>], iteration_bounds = array<i64: 2, 1>, scalar_prefetch = 0 : i64, scratch_operands = 0 : i64, tpu.core_type = #tpu.core_type<tc>, window_params = [{transform_indices = @transform_0, window_bounds = array<i64: 8, 512>}, {pipeline_mode = #tpu.pipeline_mode<synchronous>, transform_indices = @transform_1, window_bounds = array<i64: 512, 128>}, {pipeline_mode = #tpu.pipeline_mode<synchronous>, transform_indices = @transform_2, window_bounds = array<i64: 1, 128>}, {transform_indices = @transform_3, window_bounds = array<i64: 8, 128>}]} {
    %c0 = arith.constant 0 : index
    %c0_0 = arith.constant 0 : index
    %0 = vector.load %arg2[%c0, %c0_0] : memref<8x512xf32, #tpu.memory_space<vmem>>, vector<8x512xf32>
    %cst = arith.constant dense<0.000000e+00> : vector<8xf32>
    %1 = vector.multi_reduction <add>, %0, %cst [1] : vector<8x512xf32> to vector<8xf32>
    %2 = vector.shape_cast %1 : vector<8xf32> to vector<8x1xf32>
    %cst_1 = arith.constant 0.001953125 : f32
    %3 = vector.broadcast %cst_1 : f32 to vector<8x1xf32>
    %4 = arith.mulf %2, %3 : vector<8x1xf32>
    %5 = arith.mulf %0, %0 : vector<8x512xf32>
    %cst_2 = arith.constant dense<0.000000e+00> : vector<8xf32>
    %6 = vector.multi_reduction <add>, %5, %cst_2 [1] : vector<8x512xf32> to vector<8xf32>
    %7 = vector.shape_cast %6 : vector<8xf32> to vector<8x1xf32>
    %cst_3 = arith.constant 0.001953125 : f32
    %8 = vector.broadcast %cst_3 : f32 to vector<8x1xf32>
    %9 = arith.mulf %7, %8 : vector<8x1xf32>
    %10 = arith.mulf %4, %4 : vector<8x1xf32>
    %11 = arith.subf %9, %10 : vector<8x1xf32>
    %cst_4 = arith.constant 0.000000e+00 : f32
    %12 = vector.broadcast %cst_4 : f32 to vector<8x1xf32>
    %13 = arith.maximumf %11, %12 : vector<8x1xf32>
    %cst_5 = arith.constant 9.99999974E-6 : f32
    %14 = vector.broadcast %cst_5 : f32 to vector<8x1xf32>
    %15 = arith.addf %13, %14 : vector<8x1xf32>
    %16 = math.rsqrt %15 : vector<8x1xf32>
    %17 = vector.broadcast %4 : vector<8x1xf32> to vector<8x512xf32>
    %18 = arith.subf %0, %17 : vector<8x512xf32>
    %19 = vector.broadcast %16 : vector<8x1xf32> to vector<8x512xf32>
    %20 = arith.mulf %18, %19 : vector<8x512xf32>
    %c0_6 = arith.constant 0 : index
    %c0_7 = arith.constant 0 : index
    %21 = vector.load %arg3[%c0_6, %c0_7] : memref<512x128xf32, #tpu.memory_space<vmem>>, vector<512x128xf32>
    %cst_8 = arith.constant dense<0.000000e+00> : vector<8x128xf32>
    %22 = tpu.matmul %20, %21, %cst_8 {dimension_numbers = #tpu.dot_dimension_numbers<[1], [0], [0], [1], [0, 0, 1, 1], [], []>} : vector<8x512xf32>, vector<512x128xf32>, vector<8x128xf32> -> vector<8x128xf32>
    %c0_9 = arith.constant 0 : index
    %c0_10 = arith.constant 0 : index
    %23 = vector.load %arg4[%c0_9, %c0_10] : memref<1x128xf32, #tpu.memory_space<vmem>>, vector<1x128xf32>
    %24 = vector.broadcast %23 : vector<1x128xf32> to vector<8x128xf32>
    %25 = arith.addf %22, %24 : vector<8x128xf32>
    %c0_11 = arith.constant 0 : index
    %c0_12 = arith.constant 0 : index
    %26 = vector.load %arg5[%c0_11, %c0_12] : memref<8x128xf32, #tpu.memory_space<vmem>>, vector<8x128xf32>
    tpu.vector_store %arg5[%c0_11, %c0_12], %25 {strides = array<i32>} : memref<8x128xf32, #tpu.memory_space<vmem>>, vector<8x128xf32>,
    return
  }
  func.func @transform_0(%arg0: i32, %arg1: i32) -> (i32, i32) {
    %c0_i32 = arith.constant 0 : i32
    %c0_i32_0 = arith.constant 0 : i32
    return %arg0, %c0_i32 : i32, i32
  }
  func.func @transform_1(%arg0: i32, %arg1: i32) -> (i32, i32) {
    %c0_i32 = arith.constant 0 : i32
    %c0_i32_0 = arith.constant 0 : i32
    return %c0_i32, %arg1 : i32, i32
  }
  func.func @transform_2(%arg0: i32, %arg1: i32) -> (i32, i32) {
    %c0_i32 = arith.constant 0 : i32
    %c0_i32_0 = arith.constant 0 : i32
    return %c0_i32, %arg1 : i32, i32
  }
  func.func @transform_3(%arg0: i32, %arg1: i32) -> (i32, i32) {
    %c0_i32 = arith.constant 0 : i32
    return %arg0, %arg1 : i32, i32
  }
}

module attributes {stable_mosaic.version = 11 : i64} {
  func.func @_linear_head_kernel(%arg0: i32, %arg1: i32, %arg2: memref<8x512xf32, #tpu.memory_space<vmem>>, %arg3: memref<512x128xf32, #tpu.memory_space<vmem>>, %arg4: memref<1x128xf32, #tpu.memory_space<vmem>>, %arg5: memref<8x128xf32, #tpu.memory_space<vmem>>) attributes {dimension_semantics = [#tpu.dimension_semantics<parallel>, #tpu.dimension_semantics<parallel>], iteration_bounds = array<i64: 2, 1>, scalar_prefetch = 0 : i64, scratch_operands = 0 : i64, tpu.core_type = #tpu.core_type<tc>, window_params = [{transform_indices = @transform_0, window_bounds = array<i64: 8, 512>}, {transform_indices = @transform_1, window_bounds = array<i64: 512, 128>}, {transform_indices = @transform_2, window_bounds = array<i64: 1, 128>}, {transform_indices = @transform_3, window_bounds = array<i64: 8, 128>}]} {
    %c0 = arith.constant 0 : index
    %c0_0 = arith.constant 0 : index
    %0 = vector.load %arg2[%c0, %c0_0] : memref<8x512xf32, #tpu.memory_space<vmem>>, vector<8x512xf32>
    %cst = arith.constant dense<0.000000e+00> : vector<8xf32>
    %1 = vector.multi_reduction <add>, %0, %cst [1] : vector<8x512xf32> to vector<8xf32>
    %2 = vector.shape_cast %1 : vector<8xf32> to vector<8x1xf32>
    %cst_1 = arith.constant 0.001953125 : f32
    %3 = vector.broadcast %cst_1 : f32 to vector<8x1xf32>
    %4 = arith.mulf %2, %3 : vector<8x1xf32>
    %5 = arith.mulf %0, %0 : vector<8x512xf32>
    %cst_2 = arith.constant dense<0.000000e+00> : vector<8xf32>
    %6 = vector.multi_reduction <add>, %5, %cst_2 [1] : vector<8x512xf32> to vector<8xf32>
    %7 = vector.shape_cast %6 : vector<8xf32> to vector<8x1xf32>
    %cst_3 = arith.constant 0.001953125 : f32
    %8 = vector.broadcast %cst_3 : f32 to vector<8x1xf32>
    %9 = arith.mulf %7, %8 : vector<8x1xf32>
    %10 = arith.mulf %4, %4 : vector<8x1xf32>
    %11 = arith.subf %9, %10 : vector<8x1xf32>
    %cst_4 = arith.constant 0.000000e+00 : f32
    %12 = vector.broadcast %cst_4 : f32 to vector<8x1xf32>
    %13 = arith.maximumf %11, %12 : vector<8x1xf32>
    %cst_5 = arith.constant 9.99999974E-6 : f32
    %14 = vector.broadcast %cst_5 : f32 to vector<8x1xf32>
    %15 = arith.addf %13, %14 : vector<8x1xf32>
    %16 = math.rsqrt %15 : vector<8x1xf32>
    %17 = vector.broadcast %4 : vector<8x1xf32> to vector<8x512xf32>
    %18 = arith.subf %0, %17 : vector<8x512xf32>
    %19 = vector.broadcast %16 : vector<8x1xf32> to vector<8x512xf32>
    %20 = arith.mulf %18, %19 : vector<8x512xf32>
    %c0_6 = arith.constant 0 : index
    %c0_7 = arith.constant 0 : index
    %21 = vector.load %arg3[%c0_6, %c0_7] : memref<512x128xf32, #tpu.memory_space<vmem>>, vector<512x128xf32>
    %cst_8 = arith.constant dense<0.000000e+00> : vector<8x128xf32>
    %22 = tpu.matmul %20, %21, %cst_8 {dimension_numbers = #tpu.dot_dimension_numbers<[1], [0], [0], [1], [0, 0, 1, 1], [], []>} : vector<8x512xf32>, vector<512x128xf32>, vector<8x128xf32> -> vector<8x128xf32>
    %c0_9 = arith.constant 0 : index
    %c0_10 = arith.constant 0 : index
    %23 = vector.load %arg4[%c0_9, %c0_10] : memref<1x128xf32, #tpu.memory_space<vmem>>, vector<1x128xf32>
    %24 = vector.broadcast %23 : vector<1x128xf32> to vector<8x128xf32>
    %25 = arith.addf %22, %24 : vector<8x128xf32>
    %c0_11 = arith.constant 0 : index
    %c0_12 = arith.constant 0 : index
    %26 = vector.load %arg5[%c0_11, %c0_12] : memref<8x128xf32, #tpu.memory_space<vmem>>, vector<8x128xf32>
    tpu.vector_store %arg5[%c0_11, %c0_12], %25 {strides = array<i32>} : memref<8x128xf32, #tpu.memory_space<vmem>>, vector<8x128xf32>,
    return
  }
  func.func @transform_0(%arg0: i32, %arg1: i32) -> (i32, i32) {
    %c0_i32 = arith.constant 0 : i32
    %c0_i32_0 = arith.constant 0 : i32
    return %arg0, %c0_i32 : i32, i32
  }
  func.func @transform_1(%arg0: i32, %arg1: i32) -> (i32, i32) {
    %c0_i32 = arith.constant 0 : i32
    %c0_i32_0 = arith.constant 0 : i32
    return %c0_i32, %arg1 : i32, i32
  }
  func.func @transform_2(%arg0: i32, %arg1: i32) -> (i32, i32) {
    %c0_i32 = arith.constant 0 : i32
    %c0_i32_0 = arith.constant 0 : i32
    return %c0_i32, %arg1 : i32, i32
  }
  func.func @transform_3(%arg0: i32, %arg1: i32) -> (i32, i32) {
    %c0_i32 = arith.constant 0 : i32
    return %arg0, %arg1 : i32, i32
  }
}

</mosaic_0001>

<bundles_post_ra>
// kernel: tpu_custom_call.1
= control target key start
LH: loop header
LB: loop body
LE: loop exit
PB: predicated region body
PF: predicated region fallthrough
CT: control target
= control target key end

     0   :  { %8 = vsyncpa [#allocation3], 0  ;;  %s990_s0 = inlined_call_operand.hbm [shape: f32[16,512], index: 0, kind: input, shape index: {}]   ;;  %s991_s1 = inlined_call_operand.hbm [shape: f32[512,128], index: 1, kind: input, shape index: {}]   ;;  %s992_s2 = inlined_call_operand.vmem [shape: f32[1,128], index: 2, kind: input, shape index: {}]   ;;  %s993_s3 = inlined_call_operand.hbm [shape: f32[16,128], index: 3, kind: output, shape index: {}]  }
   0x1   :  { %10 = vsyncpa [#allocation3 + $0x1], 0 }
   0x2   :  { %11 = vsyncpa [#allocation6], 0 }
   0x3   :  { %12 = vsyncpa [#allocation4], 0 }
   0x4   :  { %14 = vsyncpa [#allocation4 + $0x1], 0  ;;  %s819_s12 = smov 0   ;;  %s821_s13 = smov 0  }
   0x5   :  { %s823_s14 = smov 0   ;;  %s825_s15 = smov 0  }
   0x6   :  { %s827_s16 = smov 0   ;;  %s829_s17 = smov 0  }
   0x7 LB: > { %s552_s18 = sadd.s32 4294967295, %s794_s17   ;;  %p554_p0 = scmp.ge.s32.totalorder %s794_s17, 1  ;;  %s794_s17 = sphi %s829_s17, %s20_s17   ;;  %s790_s16 = sphi %s827_s16, %s1004_s16   ;;  %s786_s15 = sphi %s825_s15, %s1003_s15   ;;  %s782_s14 = sphi %s823_s14, %s1002_s14   ;;  %s778_s13 = sphi %s821_s13, %s1001_s13   ;;  %s774_s12 = sphi %s819_s12, %s1000_s12  }
   0x8   : > { %p851_p1 = scmp.eq.s32.totalorder %s552_s18, 0  ;;  %p143_p2 = scmp.lt.s32.totalorder %s794_s17, 3 }
   0x9   : > { %s156_s22 = sshll.u32 %s991_s1, 4  ;;  %s796_s24 = smov [#allocation5]   ;;  %s157_s22 = int_to_ptr.hbm [resolvable:$true] %s156_s22 }
   0xa   : > { %p859_p3 = pnand %p554_p0, %p143_p2  ;;  %s158_s25 = sshll.u32 %s796_s24, 4  ;;  %s159_s25 = int_to_ptr.vmem [resolvable:$true] %s158_s25 }
   0xb   : > { %p557_p6 = scmp.ge.s32.totalorder %s794_s17, 2  ;;  %s797_s26 = smov 128  }
   0xc   : > { %p578_p4 = pneg %p859_p3  ;;  %s798_s27 = smov 8  }
   0xd   : > { %s553_s28 = sadd.s32 4294967294, %s794_s17   ;;  %s32_s29 = sadd.s32 1, %s790_s16 }
   0xe   : > { %p579_p5 = pnand %p578_p4, %p851_p1  ;;  %s39_s30 = sadd.s32 1, %s782_s14 }
   0xf   : > { %p34_p7 = scmp.ge.s32.totalorder %s32_s29, 2  ;;  %p46_p8 = scmp.ne.s32.totalorder %s782_s14, %s778_s13 }
  0x10   : > { %581 = dma.hbm_to_vmem [thread:$0]  (!%p579_p5), %s157_s22, 8192, %s159_s25, [#allocation6], %s797_s26, %s797_s26, %s798_s27  }
  0x11   : > { %p47_p9 = scmp.eq.s32.totalorder %s794_s17, 0  ;;  %p52_p10 = scmp.ne.s32.totalorder %s778_s13, %s774_s12 }
  0x12   : > { %s1006_s29 = smov (%p34_p7, %s32_s29), 0  ;;  %p130_p13 = scmp.eq.s32.totalorder %s552_s18, 1 }
  0x13   : > { %p878_p11 = por %p47_p9, %p46_p8  ;;  %p884_p12 = por %p851_p1, %p52_p10 }
  0x14   : > { %s36_s6 = ssub.s32 %s790_s16, %s1006_s29  ;;  %p136_p2 = scmp.eq.s32.totalorder %s553_s28, 1 }
  0x15   : > { %p37_p0 = scmp.eq.s32.totalorder %s36_s6, 0  ;;  %p890_p4 = por %p130_p13, %p46_p8 }
  0x16   : > { %p591_p5 = scmp.lt.s32.totalorder %s794_s17, 2  ;;  %p898_p7 = por %p136_p2, %p52_p10 }
  0x17   : > { %s896_s8 = scalar_select %p37_p0, %s782_s14, %s39_s30  }
  0x18   : > { %s178_s10 = sand.u32 1, %s782_s14   ;;  %s569_s20 = sshll.u32 %s790_s16, 5 }
  0x19   : > { %s558_s11 = sshll.u32 %s178_s10, 5  ;;  %s187_s18 = scalar_lea.hbm %s990_s0, %s569_s20 }
  0x1a   : > { %s182_s24 = scalar_lea.vmem [#allocation2], %s558_s11  ;;  %s189_s26 = sshll.u32 %s187_s18, 4  ;;  %s190_s26 = int_to_ptr.hbm [resolvable:$true] %s189_s26 }
  0x1b   : > { %s191_s25 = sshll.u32 %s182_s24, 4  ;;  %p583_p8 = pnand %p591_p5, %p878_p11  ;;  %s192_s25 = int_to_ptr.vmem [resolvable:$true] %s191_s25 }
  0x1c   : > { %s179_s27 = scalar_lea.sflag [#allocation3], %s178_s10  ;;  %200 = sbr.rel (%p859_p3) target bundleno = 335 (0x14f), region = 32 }
  0x1d   : > { %585 = dma.hbm_to_vmem [thread:$0]  (!%p583_p8), %s190_s26, 512, %s192_s25, %s179_s27  }
  0x1e   : > { %s912_s28 = sand.u32 (!%p859_p3), 1, %s778_s13  }
  0x1f   : > { %s562_s30 = sshll.u32 (!%p859_p3), %s912_s28, 5  ;;  %s203_s6 = scalar_lea.sflag (!%p859_p3), [#allocation3], %s912_s28 }
  0x20   : > { %s206_s11 = scalar_lea.vmem (!%p859_p3), [#allocation2], %s562_s30 }
  0x21   : > { %761 = dma.done.wait (%p884_p12), %s203_s6, 512  }
  0x22   : > { %763 = vsyncadd (%p884_p12), %s203_s6, 4294966784 }
  0x23   : > { %765 = dma.done.wait (%p851_p1), [#allocation6], 8192  }
  0x24   : > { %767 = vsyncadd (%p851_p1), [#allocation6], 4294959104  ;;  %v924_v0 = vld [vmem:[%s206_s11] sm:$0xff]  ;;  %v926_v1 = vld [vmem:[%s206_s11 + $0x8] sm:$0xff]  ;;  %s564_s4 = sshll.u32 %s912_s28, 3  ;;  %s566_s5 = sshll.u32 %s786_s15, 3 }
  0x25   : > { %v928_v2 = vld [vmem:[%s206_s11 + $0x10] sm:$0xff]  ;;  %v245_v3 = vadd.f32 %v926_v1, %v924_v0  ;;  %v251_v4 = vmul.f32 %v924_v0, %v924_v0  ;;  %v252_v5 = vmul.f32 %v926_v1, %v926_v1  ;;  %v936_v6 = vld [vmem:[%s206_s11 + $0x18] sm:$0xff]  ;;  %v296_v22 = vld [vmem:[#allocation5 + $0x68] sm:$0xff]  ;;  %s444_s21 = scalar_lea.hbm %s993_s3, %s566_s5  ;;  %s237_s22 = scalar_lea.vmem [#allocation7], %s564_s4 }
  0x26   : > { %v253_v8 = vmul.f32 %v928_v2, %v928_v2  ;;  %v254_v11 = vmul.f32 %v936_v6, %v936_v6  ;;  %v298_v14 = vld [vmem:[#allocation5 + $0x78] sm:$0xff]  ;;  %v297_v18 = vld [vmem:[#allocation5 + $0x70] sm:$0xff]  ;;  %v312_v23 = vld [vmem:[#allocation5 + $0xe8] sm:$0xff]  ;;  %s446_s18 = sshll.u32 %s237_s22, 4  ;;  %s448_s24 = sshll.u32 %s444_s21, 4  ;;  %s447_s18 = int_to_ptr.vmem [resolvable:$true] %s446_s18  ;;  %s449_s24 = int_to_ptr.hbm [resolvable:$true] %s448_s24 }
  0x27   : > { %v246_v7 = vadd.f32 %v245_v3, %v928_v2  ;;  %v255_v9 = vadd.f32 %v252_v5, %v251_v4  ;;  %v314_v15 = vld [vmem:[#allocation5 + $0xf8] sm:$0xff]  ;;  %351 = vmatpush.msra.mxu0 %v298_v14  ;;  %v313_v19 = vld [vmem:[#allocation5 + $0xf0] sm:$0xff]  ;;  %v328_v24 = vld [vmem:[#allocation5 + $0x168] sm:$0xff]  ;;  %s433_s25 = scalar_lea.sflag [#allocation4], %s912_s28  ;;  %s722_s15 = sshra.s32 %s449_s24, 4  ;;  %s723_s15 = int_to_ptr.hbm [resolvable:$true] %s722_s15 }
  0x28   : > { %v330_v16 = vld [vmem:[#allocation5 + $0x178] sm:$0xff]  ;;  %371 = vmatpush.msra.mxu1 %v314_v15  ;;  %v329_v20 = vld [vmem:[#allocation5 + $0x170] sm:$0xff]  ;;  %v344_v25 = vld [vmem:[#allocation5 + $0x1e8] sm:$0xff]  ;;  %s724_s26 = scalar_lea.hbm %s723_s15, 8  ;;  %s728_s6 = scalar_lea.hbm %s993_s3, 16 }
  0x29   : > { %v247_v10 = vadd.f32 %v246_v7, %v936_v6  ;;  %v256_v12 = vadd.f32 %v255_v9, %v253_v8  ;;  %v346_v17 = vld [vmem:[#allocation5 + $0x1f8] sm:$0xff]  ;;  %391 = vmatpush.msra.mxu2 %v330_v16  ;;  %v345_v21 = vld [vmem:[#allocation5 + $0x1f0] sm:$0xff]  ;;  %352 = vmatpush.msra.mxu0 %v297_v18  ;;  %v295_v26 = vld [vmem:[#allocation5 + $0x60] sm:$0xff]  ;;  %p725_p1 = scmp.ne.s32.totalorder %s723_s15, %s724_s26  ;;  %p729_p10 = scmp.lt.s32.totalorder %s723_s15, %s993_s3 }
  0x2a   : > { %411 = vmatpush.msra.mxu3 %v346_v17  ;;  %372 = vmatpush.msra.mxu1 %v313_v19  ;;  %v311_v27 = vld [vmem:[#allocation5 + $0xe0] sm:$0xff]  ;;  %v294_v30 = vld [vmem:[#allocation5 + $0x58] sm:$0xff]  ;;  %v293_v34 = vld [vmem:[#allocation5 + $0x50] sm:$0xff]  ;;  %p730_p11 = scmp.lt.s32.totalorder %s728_s6, %s724_s26 }
  0x2b   : > { %248 = vadd.xlane.f32.xlu0 %v247_v10  ;;  %v257_v13 = vadd.f32 %v256_v12, %v254_v11  ;;  %392 = vmatpush.msra.mxu2 %v329_v20  ;;  %v327_v28 = vld [vmem:[#allocation5 + $0x160] sm:$0xff]  ;;  %v310_v31 = vld [vmem:[#allocation5 + $0xd8] sm:$0xff]  ;;  %v309_v35 = vld [vmem:[#allocation5 + $0xd0] sm:$0xff]  ;;  %p726_p3 = pnand %p725_p1, %p890_p4 }
  0x2c   : > { %412 = vmatpush.msra.mxu3 %v345_v21  ;;  %353 = vmatpush.msra.mxu0 %v296_v22  ;;  %v343_v29 = vld [vmem:[#allocation5 + $0x1e0] sm:$0xff]  ;;  %v326_v32 = vld [vmem:[#allocation5 + $0x158] sm:$0xff]  ;;  %v325_v36 = vld [vmem:[#allocation5 + $0x150] sm:$0xff]  ;;  %p731_p12 = por %p730_p11, %p729_p10 }
  0x2d   : > { %373 = vmatpush.msra.mxu1 %v312_v23  ;;  %393 = vmatpush.msra.mxu2 %v328_v24  ;;  %v342_v33 = vld [vmem:[#allocation5 + $0x1d8] sm:$0xff]  ;;  %v341_v37 = vld [vmem:[#allocation5 + $0x1d0] sm:$0xff]  ;;  %v292_v38 = vld [vmem:[#allocation5 + $0x48] sm:$0xff]  ;;  %p727_p9 = pneg %p726_p3 }
  0x2e   : > { %413 = vmatpush.msra.mxu3 %v344_v25  ;;  %354 = vmatpush.msra.mxu0 %v295_v26  ;;  %v308_v39 = vld [vmem:[#allocation5 + $0xc8] sm:$0xff]  ;;  %v291_v42 = vld [vmem:[#allocation5 + $0x40] sm:$0xff]  ;;  %v290_v46 = vld [vmem:[#allocation5 + $0x38] sm:$0xff] }
  0x2f   : > { %374 = vmatpush.msra.mxu1 %v311_v27  ;;  %394 = vmatpush.msra.mxu2 %v327_v28  ;;  %v324_v40 = vld [vmem:[#allocation5 + $0x148] sm:$0xff]  ;;  %v307_v43 = vld [vmem:[#allocation5 + $0xc0] sm:$0xff]  ;;  %v306_v47 = vld [vmem:[#allocation5 + $0xb8] sm:$0xff]  ;;  %p732_p13 = pnand %p731_p12, %p727_p9 }
  0x30   : > { %414 = vmatpush.msra.mxu3 %v343_v29  ;;  %355 = vmatpush.msra.mxu0 %v294_v30  ;;  %v340_v41 = vld [vmem:[#allocation5 + $0x1c8] sm:$0xff]  ;;  %v323_v44 = vld [vmem:[#allocation5 + $0x140] sm:$0xff]  ;;  %v322_v48 = vld [vmem:[#allocation5 + $0x138] sm:$0xff] }
  0x31   : > { %375 = vmatpush.msra.mxu1 %v310_v31  ;;  %395 = vmatpush.msra.mxu2 %v326_v32  ;;  %v339_v45 = vld [vmem:[#allocation5 + $0x1c0] sm:$0xff]  ;;  %v338_v49 = vld [vmem:[#allocation5 + $0x1b8] sm:$0xff]  ;;  %v289_v50 = vld [vmem:[#allocation5 + $0x30] sm:$0xff] }
  0x32   : > { %415 = vmatpush.msra.mxu3 %v342_v33  ;;  %356 = vmatpush.msra.mxu0 %v293_v34  ;;  %v305_v51 = vld [vmem:[#allocation5 + $0xb0] sm:$0xff]  ;;  %v288_v54 = vld [vmem:[#allocation5 + $0x28] sm:$0xff]  ;;  %v287_v58 = vld [vmem:[#allocation5 + $0x20] sm:$0xff] }
  0x33   : > { %258 = vadd.xlane.f32.xlu0 %v257_v13  ;;  %376 = vmatpush.msra.mxu1 %v309_v35  ;;  %v321_v52 = vld [vmem:[#allocation5 + $0x130] sm:$0xff]  ;;  %v304_v55 = vld [vmem:[#allocation5 + $0xa8] sm:$0xff]  ;;  %v303_v59 = vld [vmem:[#allocation5 + $0xa0] sm:$0xff] }
  0x34   : > { %396 = vmatpush.msra.mxu2 %v325_v36  ;;  %416 = vmatpush.msra.mxu3 %v341_v37  ;;  %v337_v53 = vld [vmem:[#allocation5 + $0x1b0] sm:$0xff]  ;;  %v320_v56 = vld [vmem:[#allocation5 + $0x128] sm:$0xff]  ;;  %v319_v60 = vld [vmem:[#allocation5 + $0x120] sm:$0xff] }
  0x35   : > { %357 = vmatpush.msra.mxu0 %v292_v38  ;;  %377 = vmatpush.msra.mxu1 %v308_v39  ;;  %v336_v57 = vld [vmem:[#allocation5 + $0x1a8] sm:$0xff]  ;;  %v335_v61 = vld [vmem:[#allocation5 + $0x1a0] sm:$0xff]  ;;  %v286_v62 = vld [vmem:[#allocation5 + $0x18] sm:$0xff] }
  0x36   : > { %397 = vmatpush.msra.mxu2 %v324_v40  ;;  %417 = vmatpush.msra.mxu3 %v340_v41  ;;  %v302_v63 = vld [vmem:[#allocation5 + $0x98] sm:$0xff]  ;;  %v285_v5 = vld [vmem:[#allocation5 + $0x10] sm:$0xff]  ;;  %v284_v10 = vld [vmem:[#allocation5 + $0x8] sm:$0xff] }
  0x37   : > { %358 = vmatpush.msra.mxu0 %v291_v42  ;;  %378 = vmatpush.msra.mxu1 %v307_v43  ;;  %v318_v3 = vld [vmem:[#allocation5 + $0x118] sm:$0xff]  ;;  %v301_v7 = vld [vmem:[#allocation5 + $0x90] sm:$0xff]  ;;  %v300_v12 = vld [vmem:[#allocation5 + $0x88] sm:$0xff] }
  0x38   : > { %398 = vmatpush.msra.mxu2 %v323_v44  ;;  %418 = vmatpush.msra.mxu3 %v339_v45  ;;  %v334_v4 = vld [vmem:[#allocation5 + $0x198] sm:$0xff]  ;;  %v317_v8 = vld [vmem:[#allocation5 + $0x110] sm:$0xff]  ;;  %v316_v13 = vld [vmem:[#allocation5 + $0x108] sm:$0xff] }
  0x39   : > { %359 = vmatpush.msra.mxu0 %v290_v46  ;;  %379 = vmatpush.msra.mxu1 %v306_v47  ;;  %v333_v9 = vld [vmem:[#allocation5 + $0x190] sm:$0xff]  ;;  %v332_v14 = vld [vmem:[#allocation5 + $0x188] sm:$0xff]  ;;  %v283_v15 = vld [vmem:[#allocation5] sm:$0xff] }
  0x3a   : > { %399 = vmatpush.msra.mxu2 %v322_v48  ;;  %419 = vmatpush.msra.mxu3 %v338_v49  ;;  %v299_v16 = vld [vmem:[#allocation5 + $0x80] sm:$0xff] }
  0x3b   : > { %360 = vmatpush.msra.mxu0 %v289_v50  ;;  %380 = vmatpush.msra.mxu1 %v305_v51  ;;  %v315_v17 = vld [vmem:[#allocation5 + $0x100] sm:$0xff] }
  0x3c   : > { %400 = vmatpush.msra.mxu2 %v321_v52  ;;  %420 = vmatpush.msra.mxu3 %v337_v53  ;;  %v331_v18 = vld [vmem:[#allocation5 + $0x180] sm:$0xff] }
  0x3d   : > { %361 = vmatpush.msra.mxu0 %v288_v54  ;;  %381 = vmatpush.msra.mxu1 %v304_v55 }
  0x3e   : > { %401 = vmatpush.msra.mxu2 %v320_v56  ;;  %421 = vmatpush.msra.mxu3 %v336_v57 }
  0x3f   : > { %362 = vmatpush.msra.mxu0 %v287_v58  ;;  %382 = vmatpush.msra.mxu1 %v303_v59 }
  0x40   : > { %402 = vmatpush.msra.mxu2 %v319_v60  ;;  %422 = vmatpush.msra.mxu3 %v335_v61 }
  0x41   : > { %363 = vmatpush.msra.mxu0 %v286_v62  ;;  %383 = vmatpush.msra.mxu1 %v302_v63 }
  0x42   : > { %403 = vmatpush.msra.mxu2 %v318_v3  ;;  %423 = vmatpush.msra.mxu3 %v334_v4 }
  0x43   : > { %364 = vmatpush.msra.mxu0 %v285_v5  ;;  %384 = vmatpush.msra.mxu1 %v301_v7 }
  0x44   : > { %404 = vmatpush.msra.mxu2 %v317_v8  ;;  %424 = vmatpush.msra.mxu3 %v333_v9 }
  0x45   : > { %365 = vmatpush.msra.mxu0 %v284_v10  ;;  %385 = vmatpush.msra.mxu1 %v300_v12 }
  0x46   : > { %405 = vmatpush.msra.mxu2 %v316_v13  ;;  %425 = vmatpush.msra.mxu3 %v332_v14 }
  0x47   : > { %366 = vmatpush.msra.mxu0 %v283_v15  ;;  %386 = vmatpush.msra.mxu1 %v299_v16 }
  0x48   : > { %406 = vmatpush.msra.mxu2 %v315_v17  ;;  %426 = vmatpush.msra.mxu3 %v331_v18 }
  0x9e   : > { %v249_v11 = vpop.xlane.xlu0 %248 }
  0x9f   : > { %v250_v19 = vmul.f32 0.001953125, %v249_v11 }
  0xa1   : > { %v261_v21 = vmul.f32 %v250_v19, %v250_v19  ;;  %v275_v32 = vsub.f32 %v924_v0, %v250_v19  ;;  %v276_v33 = vsub.f32 %v926_v1, %v250_v19  ;;  %v277_v34 = vsub.f32 %v928_v2, %v250_v19  ;;  %v645_v0 = vld [vmem:[%s992_s2] ss:$0 sm:$0xff] }
  0xa2   : > { %v278_v35 = vsub.f32 %v936_v6, %v250_v19 }
  0xa6   : > { %v259_v20 = vpop.xlane.xlu0 %258 }
  0xa7   : > { %v260_v22 = vmul.f32 0.001953125, %v259_v20 }
  0xa9   : > { %v262_v23 = vsub.f32 %v260_v22, %v261_v21 }
  0xab   : > { %v263_v24 = vmax.f32 %v262_v23, 0.0 }
  0xad   : > { %v264_v25 = vadd.f32 1e-05, %v263_v24 }
  0xaf   : > { %646 = vrsqrt.f32 %v264_v25  ;;  %vm271_vm1 = vweird.f32 %v264_v25 }
  0xb5   : > { %v647_v26 = vpop.eup %646 }
  0xb6   : > { %v266_v27 = vmul.f32 %v647_v26, %v264_v25  ;;  %vm272_vm0 = vweird.f32 %v647_v26 }
  0xb7   : > { %vm273_vm2 = vmor %vm271_vm1, %vm272_vm0 }
  0xb8   : > { %v267_v28 = vmul.f32 %v647_v26, %v266_v27 }
  0xba   : > { %v268_v29 = vmul.f32 0.5, %v267_v28 }
  0xbc   : > { %v269_v30 = vsub.f32 1.5, %v268_v29 }
  0xbe   : > { %v270_v31 = vmul.f32 %v647_v26, %v269_v30 }
  0xc0   : > { %v274_v36 = vsel %vm273_vm2, %v647_v26, %v270_v31 }
  0xc1   : > { %v279_v37 = vmul.f32 %v275_v32, %v274_v36  ;;  %v280_v38 = vmul.f32 %v276_v33, %v274_v36  ;;  %v281_v39 = vmul.f32 %v277_v34, %v274_v36  ;;  %v282_v40 = vmul.f32 %v278_v35, %v274_v36 }
  0xc3   : > { %367 = vmatmul.f32.vlgmr.msra.gmra.mxu0 %v279_v37  ;;  %387 = vmatmul.f32.vlgmr.msra.gmra.mxu1 %v280_v38 }
  0xc4   : > { %407 = vmatmul.f32.vlgmr.msra.gmra.mxu2 %v281_v39  ;;  %427 = vmatmul.f32.vlgmr.msra.gmra.mxu3 %v282_v40 }
 0x140   : > { %v368_v41 = vpop.f32.mrf.mxu0  ;;  %v388_v2 = vpop.f32.mrf.mxu1 }
 0x141   : > { %v369_v1 = vadd.f32 %v645_v0, %v368_v41 }
 0x143   : > { %v389_v6 = vadd.f32 %v388_v2, %v369_v1 }
 0x147   : > { %v408_v42 = vpop.f32.mrf.mxu2  ;;  %v428_v44 = vpop.f32.mrf.mxu3 }
 0x148   : > { %v409_v43 = vadd.f32 %v408_v42, %v389_v6 }
 0x14a   : > { %v429_v45 = vadd.f32 %v428_v44, %v409_v43 }
 0x14c   : > { %431 = vst [vmem:[%s237_s22] sm:$0xff] %v429_v45 }
 0x14d   : > { %735 = shalt.err (!%p732_p13)
}
 0x14e   : > { %576 = dma.vmem_to_hbm [thread:$0]  (%p890_p4), %s447_s18, 128, %s449_s24, %s433_s25  }
 0x14f PF: > { %s460_s28 = sand.u32 1, %s774_s12   ;;  %p587_p0 = pnand %p557_p6, %p898_p7 }
 0x150   : > { %s461_s23 = scalar_lea.sflag [#allocation4], %s460_s28 }
 0x151   : > { %p588_p2 = pneg %p587_p0 }
 0x153   : > { %769 = dma.done.wait (%p588_p2), %s461_s23, 128  }
 0x154   : > { %771 = vsyncadd (%p588_p2), %s461_s23, 4294967168  ;;  %s20_s17 = sadd.s32 1, %s794_s17   ;;  %s1000_s12 = smov %s778_s13 }
 0x155   : > { %p17_p5 = scmp.ge.s32.totalorder %s20_s17, 4   ;;  %s1001_s13 = smov %s782_s14 }
 0x156   : > { %s1002_s14 = smov %s896_s8  ;;  %s1003_s15 = smov %s790_s16 }
 0x157   : > { %s1004_s16 = smov %s1006_s29  ;;  %19 = sbr.rel (!%p17_p5) target bundleno = 7 (0x7), region = 85 }
 0x15c   :  { %467 = vsyncpa [#allocation3], 1 }
 0x15d   :  { %469 = vsyncpa [#allocation3 + $0x1], 1 }
 0x15e   :  { %470 = vsyncpa [#allocation6], 1 }
 0x15f   :  { %471 = vsyncpa [#allocation4], 1 }
 0x160   :  { %473 = vsyncpa [#allocation4 + $0x1], 1 }

// kernel: tpu_custom_call.1
= control target key start
LH: loop header
LB: loop body
LE: loop exit
PB: predicated region body
PF: predicated region fallthrough
CT: control target
= control target key end

     0   :  { %8 = vsyncpa [#allocation3], 0  ;;  %s990_s0 = inlined_call_operand.hbm [shape: f32[16,512], index: 0, kind: input, shape index: {}]   ;;  %s991_s1 = inlined_call_operand.hbm [shape: f32[512,128], index: 1, kind: input, shape index: {}]   ;;  %s992_s2 = inlined_call_operand.vmem [shape: f32[1,128], index: 2, kind: input, shape index: {}]   ;;  %s993_s3 = inlined_call_operand.hbm [shape: f32[16,128], index: 3, kind: output, shape index: {}]  }
   0x1   :  { %10 = vsyncpa [#allocation3 + $0x1], 0 }
   0x2   :  { %11 = vsyncpa [#allocation6], 0 }
   0x3   :  { %12 = vsyncpa [#allocation4], 0 }
   0x4   :  { %14 = vsyncpa [#allocation4 + $0x1], 0  ;;  %s819_s12 = smov 0   ;;  %s821_s13 = smov 0  }
   0x5   :  { %s823_s14 = smov 0   ;;  %s825_s15 = smov 0  }
   0x6   :  { %s827_s16 = smov 0   ;;  %s829_s17 = smov 0  }
   0x7 LB: > { %s552_s18 = sadd.s32 4294967295, %s794_s17   ;;  %p554_p0 = scmp.ge.s32.totalorder %s794_s17, 1  ;;  %s794_s17 = sphi %s829_s17, %s20_s17   ;;  %s790_s16 = sphi %s827_s16, %s1004_s16   ;;  %s786_s15 = sphi %s825_s15, %s1003_s15   ;;  %s782_s14 = sphi %s823_s14, %s1002_s14   ;;  %s778_s13 = sphi %s821_s13, %s1001_s13   ;;  %s774_s12 = sphi %s819_s12, %s1000_s12  }
   0x8   : > { %p851_p1 = scmp.eq.s32.totalorder %s552_s18, 0  ;;  %p143_p2 = scmp.lt.s32.totalorder %s794_s17, 3 }
   0x9   : > { %s156_s22 = sshll.u32 %s991_s1, 4  ;;  %s796_s24 = smov [#allocation5]   ;;  %s157_s22 = int_to_ptr.hbm [resolvable:$true] %s156_s22 }
   0xa   : > { %p859_p3 = pnand %p554_p0, %p143_p2  ;;  %s158_s25 = sshll.u32 %s796_s24, 4  ;;  %s159_s25 = int_to_ptr.vmem [resolvable:$true] %s158_s25 }
   0xb   : > { %p557_p6 = scmp.ge.s32.totalorder %s794_s17, 2  ;;  %s797_s26 = smov 128  }
   0xc   : > { %p578_p4 = pneg %p859_p3  ;;  %s798_s27 = smov 8  }
   0xd   : > { %s553_s28 = sadd.s32 4294967294, %s794_s17   ;;  %s32_s29 = sadd.s32 1, %s790_s16 }
   0xe   : > { %p579_p5 = pnand %p578_p4, %p851_p1  ;;  %s39_s30 = sadd.s32 1, %s782_s14 }
   0xf   : > { %p34_p7 = scmp.ge.s32.totalorder %s32_s29, 2  ;;  %p46_p8 = scmp.ne.s32.totalorder %s782_s14, %s778_s13 }
  0x10   : > { %581 = dma.hbm_to_vmem [thread:$0]  (!%p579_p5), %s157_s22, 8192, %s159_s25, [#allocation6], %s797_s26, %s797_s26, %s798_s27  }
  0x11   : > { %p47_p9 = scmp.eq.s32.totalorder %s794_s17, 0  ;;  %p52_p10 = scmp.ne.s32.totalorder %s778_s13, %s774_s12 }
  0x12   : > { %s1006_s29 = smov (%p34_p7, %s32_s29), 0  ;;  %p130_p13 = scmp.eq.s32.totalorder %s552_s18, 1 }
  0x13   : > { %p878_p11 = por %p47_p9, %p46_p8  ;;  %p884_p12 = por %p851_p1, %p52_p10 }
  0x14   : > { %s36_s6 = ssub.s32 %s790_s16, %s1006_s29  ;;  %p136_p2 = scmp.eq.s32.totalorder %s553_s28, 1 }
  0x15   : > { %p37_p0 = scmp.eq.s32.totalorder %s36_s6, 0  ;;  %p890_p4 = por %p130_p13, %p46_p8 }
  0x16   : > { %p591_p5 = scmp.lt.s32.totalorder %s794_s17, 2  ;;  %p898_p7 = por %p136_p2, %p52_p10 }
  0x17   : > { %s896_s8 = scalar_select %p37_p0, %s782_s14, %s39_s30  }
  0x18   : > { %s178_s10 = sand.u32 1, %s782_s14   ;;  %s569_s20 = sshll.u32 %s790_s16, 5 }
  0x19   : > { %s558_s11 = sshll.u32 %s178_s10, 5  ;;  %s187_s18 = scalar_lea.hbm %s990_s0, %s569_s20 }
  0x1a   : > { %s182_s24 = scalar_lea.vmem [#allocation2], %s558_s11  ;;  %s189_s26 = sshll.u32 %s187_s18, 4  ;;  %s190_s26 = int_to_ptr.hbm [resolvable:$true] %s189_s26 }
  0x1b   : > { %s191_s25 = sshll.u32 %s182_s24, 4  ;;  %p583_p8 = pnand %p591_p5, %p878_p11  ;;  %s192_s25 = int_to_ptr.vmem [resolvable:$true] %s191_s25 }
  0x1c   : > { %s179_s27 = scalar_lea.sflag [#allocation3], %s178_s10  ;;  %200 = sbr.rel (%p859_p3) target bundleno = 335 (0x14f), region = 32 }
  0x1d   : > { %585 = dma.hbm_to_vmem [thread:$0]  (!%p583_p8), %s190_s26, 512, %s192_s25, %s179_s27  }
  0x1e   : > { %s912_s28 = sand.u32 (!%p859_p3), 1, %s778_s13  }
  0x1f   : > { %s562_s30 = sshll.u32 (!%p859_p3), %s912_s28, 5  ;;  %s203_s6 = scalar_lea.sflag (!%p859_p3), [#allocation3], %s912_s28 }
  0x20   : > { %s206_s11 = scalar_lea.vmem (!%p859_p3), [#allocation2], %s562_s30 }
  0x21   : > { %761 = dma.done.wait (%p884_p12), %s203_s6, 512  }
  0x22   : > { %763 = vsyncadd (%p884_p12), %s203_s6, 4294966784 }
  0x23   : > { %765 = dma.done.wait (%p851_p1), [#allocation6], 8192  }
  0x24   : > { %767 = vsyncadd (%p851_p1), [#allocation6], 4294959104  ;;  %v924_v0 = vld [vmem:[%s206_s11] sm:$0xff]  ;;  %v926_v1 = vld [vmem:[%s206_s11 + $0x8] sm:$0xff]  ;;  %s564_s4 = sshll.u32 %s912_s28, 3  ;;  %s566_s5 = sshll.u32 %s786_s15, 3 }
  0x25   : > { %v928_v2 = vld [vmem:[%s206_s11 + $0x10] sm:$0xff]  ;;  %v245_v3 = vadd.f32 %v926_v1, %v924_v0  ;;  %v251_v4 = vmul.f32 %v924_v0, %v924_v0  ;;  %v252_v5 = vmul.f32 %v926_v1, %v926_v1  ;;  %v936_v6 = vld [vmem:[%s206_s11 + $0x18] sm:$0xff]  ;;  %v296_v22 = vld [vmem:[#allocation5 + $0x68] sm:$0xff]  ;;  %s444_s21 = scalar_lea.hbm %s993_s3, %s566_s5  ;;  %s237_s22 = scalar_lea.vmem [#allocation7], %s564_s4 }
  0x26   : > { %v253_v8 = vmul.f32 %v928_v2, %v928_v2  ;;  %v254_v11 = vmul.f32 %v936_v6, %v936_v6  ;;  %v298_v14 = vld [vmem:[#allocation5 + $0x78] sm:$0xff]  ;;  %v297_v18 = vld [vmem:[#allocation5 + $0x70] sm:$0xff]  ;;  %v312_v23 = vld [vmem:[#allocation5 + $0xe8] sm:$0xff]  ;;  %s446_s18 = sshll.u32 %s237_s22, 4  ;;  %s448_s24 = sshll.u32 %s444_s21, 4  ;;  %s447_s18 = int_to_ptr.vmem [resolvable:$true] %s446_s18  ;;  %s449_s24 = int_to_ptr.hbm [resolvable:$true] %s448_s24 }
  0x27   : > { %v246_v7 = vadd.f32 %v245_v3, %v928_v2  ;;  %v255_v9 = vadd.f32 %v252_v5, %v251_v4  ;;  %v314_v15 = vld [vmem:[#allocation5 + $0xf8] sm:$0xff]  ;;  %351 = vmatpush.msra.mxu0 %v298_v14  ;;  %v313_v19 = vld [vmem:[#allocation5 + $0xf0] sm:$0xff]  ;;  %v328_v24 = vld [vmem:[#allocation5 + $0x168] sm:$0xff]  ;;  %s433_s25 = scalar_lea.sflag [#allocation4], %s912_s28  ;;  %s722_s15 = sshra.s32 %s449_s24, 4  ;;  %s723_s15 = int_to_ptr.hbm [resolvable:$true] %s722_s15 }
  0x28   : > { %v330_v16 = vld [vmem:[#allocation5 + $0x178] sm:$0xff]  ;;  %371 = vmatpush.msra.mxu1 %v314_v15  ;;  %v329_v20 = vld [vmem:[#allocation5 + $0x170] sm:$0xff]  ;;  %v344_v25 = vld [vmem:[#allocation5 + $0x1e8] sm:$0xff]  ;;  %s724_s26 = scalar_lea.hbm %s723_s15, 8  ;;  %s728_s6 = scalar_lea.hbm %s993_s3, 16 }
  0x29   : > { %v247_v10 = vadd.f32 %v246_v7, %v936_v6  ;;  %v256_v12 = vadd.f32 %v255_v9, %v253_v8  ;;  %v346_v17 = vld [vmem:[#allocation5 + $0x1f8] sm:$0xff]  ;;  %391 = vmatpush.msra.mxu2 %v330_v16  ;;  %v345_v21 = vld [vmem:[#allocation5 + $0x1f0] sm:$0xff]  ;;  %352 = vmatpush.msra.mxu0 %v297_v18  ;;  %v295_v26 = vld [vmem:[#allocation5 + $0x60] sm:$0xff]  ;;  %p725_p1 = scmp.ne.s32.totalorder %s723_s15, %s724_s26  ;;  %p729_p10 = scmp.lt.s32.totalorder %s723_s15, %s993_s3 }
  0x2a   : > { %411 = vmatpush.msra.mxu3 %v346_v17  ;;  %372 = vmatpush.msra.mxu1 %v313_v19  ;;  %v311_v27 = vld [vmem:[#allocation5 + $0xe0] sm:$0xff]  ;;  %v294_v30 = vld [vmem:[#allocation5 + $0x58] sm:$0xff]  ;;  %v293_v34 = vld [vmem:[#allocation5 + $0x50] sm:$0xff]  ;;  %p730_p11 = scmp.lt.s32.totalorder %s728_s6, %s724_s26 }
  0x2b   : > { %248 = vadd.xlane.f32.xlu0 %v247_v10  ;;  %v257_v13 = vadd.f32 %v256_v12, %v254_v11  ;;  %392 = vmatpush.msra.mxu2 %v329_v20  ;;  %v327_v28 = vld [vmem:[#allocation5 + $0x160] sm:$0xff]  ;;  %v310_v31 = vld [vmem:[#allocation5 + $0xd8] sm:$0xff]  ;;  %v309_v35 = vld [vmem:[#allocation5 + $0xd0] sm:$0xff]  ;;  %p726_p3 = pnand %p725_p1, %p890_p4 }
  0x2c   : > { %412 = vmatpush.msra.mxu3 %v345_v21  ;;  %353 = vmatpush.msra.mxu0 %v296_v22  ;;  %v343_v29 = vld [vmem:[#allocation5 + $0x1e0] sm:$0xff]  ;;  %v326_v32 = vld [vmem:[#allocation5 + $0x158] sm:$0xff]  ;;  %v325_v36 = vld [vmem:[#allocation5 + $0x150] sm:$0xff]  ;;  %p731_p12 = por %p730_p11, %p729_p10 }
  0x2d   : > { %373 = vmatpush.msra.mxu1 %v312_v23  ;;  %393 = vmatpush.msra.mxu2 %v328_v24  ;;  %v342_v33 = vld [vmem:[#allocation5 + $0x1d8] sm:$0xff]  ;;  %v341_v37 = vld [vmem:[#allocation5 + $0x1d0] sm:$0xff]  ;;  %v292_v38 = vld [vmem:[#allocation5 + $0x48] sm:$0xff]  ;;  %p727_p9 = pneg %p726_p3 }
  0x2e   : > { %413 = vmatpush.msra.mxu3 %v344_v25  ;;  %354 = vmatpush.msra.mxu0 %v295_v26  ;;  %v308_v39 = vld [vmem:[#allocation5 + $0xc8] sm:$0xff]  ;;  %v291_v42 = vld [vmem:[#allocation5 + $0x40] sm:$0xff]  ;;  %v290_v46 = vld [vmem:[#allocation5 + $0x38] sm:$0xff] }
  0x2f   : > { %374 = vmatpush.msra.mxu1 %v311_v27  ;;  %394 = vmatpush.msra.mxu2 %v327_v28  ;;  %v324_v40 = vld [vmem:[#allocation5 + $0x148] sm:$0xff]  ;;  %v307_v43 = vld [vmem:[#allocation5 + $0xc0] sm:$0xff]  ;;  %v306_v47 = vld [vmem:[#allocation5 + $0xb8] sm:$0xff]  ;;  %p732_p13 = pnand %p731_p12, %p727_p9 }
  0x30   : > { %414 = vmatpush.msra.mxu3 %v343_v29  ;;  %355 = vmatpush.msra.mxu0 %v294_v30  ;;  %v340_v41 = vld [vmem:[#allocation5 + $0x1c8] sm:$0xff]  ;;  %v323_v44 = vld [vmem:[#allocation5 + $0x140] sm:$0xff]  ;;  %v322_v48 = vld [vmem:[#allocation5 + $0x138] sm:$0xff] }
  0x31   : > { %375 = vmatpush.msra.mxu1 %v310_v31  ;;  %395 = vmatpush.msra.mxu2 %v326_v32  ;;  %v339_v45 = vld [vmem:[#allocation5 + $0x1c0] sm:$0xff]  ;;  %v338_v49 = vld [vmem:[#allocation5 + $0x1b8] sm:$0xff]  ;;  %v289_v50 = vld [vmem:[#allocation5 + $0x30] sm:$0xff] }
  0x32   : > { %415 = vmatpush.msra.mxu3 %v342_v33  ;;  %356 = vmatpush.msra.mxu0 %v293_v34  ;;  %v305_v51 = vld [vmem:[#allocation5 + $0xb0] sm:$0xff]  ;;  %v288_v54 = vld [vmem:[#allocation5 + $0x28] sm:$0xff]  ;;  %v287_v58 = vld [vmem:[#allocation5 + $0x20] sm:$0xff] }
  0x33   : > { %258 = vadd.xlane.f32.xlu0 %v257_v13  ;;  %376 = vmatpush.msra.mxu1 %v309_v35  ;;  %v321_v52 = vld [vmem:[#allocation5 + $0x130] sm:$0xff]  ;;  %v304_v55 = vld [vmem:[#allocation5 + $0xa8] sm:$0xff]  ;;  %v303_v59 = vld [vmem:[#allocation5 + $0xa0] sm:$0xff] }
  0x34   : > { %396 = vmatpush.msra.mxu2 %v325_v36  ;;  %416 = vmatpush.msra.mxu3 %v341_v37  ;;  %v337_v53 = vld [vmem:[#allocation5 + $0x1b0] sm:$0xff]  ;;  %v320_v56 = vld [vmem:[#allocation5 + $0x128] sm:$0xff]  ;;  %v319_v60 = vld [vmem:[#allocation5 + $0x120] sm:$0xff] }
  0x35   : > { %357 = vmatpush.msra.mxu0 %v292_v38  ;;  %377 = vmatpush.msra.mxu1 %v308_v39  ;;  %v336_v57 = vld [vmem:[#allocation5 + $0x1a8] sm:$0xff]  ;;  %v335_v61 = vld [vmem:[#allocation5 + $0x1a0] sm:$0xff]  ;;  %v286_v62 = vld [vmem:[#allocation5 + $0x18] sm:$0xff] }
  0x36   : > { %397 = vmatpush.msra.mxu2 %v324_v40  ;;  %417 = vmatpush.msra.mxu3 %v340_v41  ;;  %v302_v63 = vld [vmem:[#allocation5 + $0x98] sm:$0xff]  ;;  %v285_v5 = vld [vmem:[#allocation5 + $0x10] sm:$0xff]  ;;  %v284_v10 = vld [vmem:[#allocation5 + $0x8] sm:$0xff] }
  0x37   : > { %358 = vmatpush.msra.mxu0 %v291_v42  ;;  %378 = vmatpush.msra.mxu1 %v307_v43  ;;  %v318_v3 = vld [vmem:[#allocation5 + $0x118] sm:$0xff]  ;;  %v301_v7 = vld [vmem:[#allocation5 + $0x90] sm:$0xff]  ;;  %v300_v12 = vld [vmem:[#allocation5 + $0x88] sm:$0xff] }
  0x38   : > { %398 = vmatpush.msra.mxu2 %v323_v44  ;;  %418 = vmatpush.msra.mxu3 %v339_v45  ;;  %v334_v4 = vld [vmem:[#allocation5 + $0x198] sm:$0xff]  ;;  %v317_v8 = vld [vmem:[#allocation5 + $0x110] sm:$0xff]  ;;  %v316_v13 = vld [vmem:[#allocation5 + $0x108] sm:$0xff] }
  0x39   : > { %359 = vmatpush.msra.mxu0 %v290_v46  ;;  %379 = vmatpush.msra.mxu1 %v306_v47  ;;  %v333_v9 = vld [vmem:[#allocation5 + $0x190] sm:$0xff]  ;;  %v332_v14 = vld [vmem:[#allocation5 + $0x188] sm:$0xff]  ;;  %v283_v15 = vld [vmem:[#allocation5] sm:$0xff] }
  0x3a   : > { %399 = vmatpush.msra.mxu2 %v322_v48  ;;  %419 = vmatpush.msra.mxu3 %v338_v49  ;;  %v299_v16 = vld [vmem:[#allocation5 + $0x80] sm:$0xff] }
  0x3b   : > { %360 = vmatpush.msra.mxu0 %v289_v50  ;;  %380 = vmatpush.msra.mxu1 %v305_v51  ;;  %v315_v17 = vld [vmem:[#allocation5 + $0x100] sm:$0xff] }
  0x3c   : > { %400 = vmatpush.msra.mxu2 %v321_v52  ;;  %420 = vmatpush.msra.mxu3 %v337_v53  ;;  %v331_v18 = vld [vmem:[#allocation5 + $0x180] sm:$0xff] }
  0x3d   : > { %361 = vmatpush.msra.mxu0 %v288_v54  ;;  %381 = vmatpush.msra.mxu1 %v304_v55 }
  0x3e   : > { %401 = vmatpush.msra.mxu2 %v320_v56  ;;  %421 = vmatpush.msra.mxu3 %v336_v57 }
  0x3f   : > { %362 = vmatpush.msra.mxu0 %v287_v58  ;;  %382 = vmatpush.msra.mxu1 %v303_v59 }
  0x40   : > { %402 = vmatpush.msra.mxu2 %v319_v60  ;;  %422 = vmatpush.msra.mxu3 %v335_v61 }
  0x41   : > { %363 = vmatpush.msra.mxu0 %v286_v62  ;;  %383 = vmatpush.msra.mxu1 %v302_v63 }
  0x42   : > { %403 = vmatpush.msra.mxu2 %v318_v3  ;;  %423 = vmatpush.msra.mxu3 %v334_v4 }
  0x43   : > { %364 = vmatpush.msra.mxu0 %v285_v5  ;;  %384 = vmatpush.msra.mxu1 %v301_v7 }
  0x44   : > { %404 = vmatpush.msra.mxu2 %v317_v8  ;;  %424 = vmatpush.msra.mxu3 %v333_v9 }
  0x45   : > { %365 = vmatpush.msra.mxu0 %v284_v10  ;;  %385 = vmatpush.msra.mxu1 %v300_v12 }
  0x46   : > { %405 = vmatpush.msra.mxu2 %v316_v13  ;;  %425 = vmatpush.msra.mxu3 %v332_v14 }
  0x47   : > { %366 = vmatpush.msra.mxu0 %v283_v15  ;;  %386 = vmatpush.msra.mxu1 %v299_v16 }
  0x48   : > { %406 = vmatpush.msra.mxu2 %v315_v17  ;;  %426 = vmatpush.msra.mxu3 %v331_v18 }
  0x9e   : > { %v249_v11 = vpop.xlane.xlu0 %248 }
  0x9f   : > { %v250_v19 = vmul.f32 0.001953125, %v249_v11 }
  0xa1   : > { %v261_v21 = vmul.f32 %v250_v19, %v250_v19  ;;  %v275_v32 = vsub.f32 %v924_v0, %v250_v19  ;;  %v276_v33 = vsub.f32 %v926_v1, %v250_v19  ;;  %v277_v34 = vsub.f32 %v928_v2, %v250_v19  ;;  %v645_v0 = vld [vmem:[%s992_s2] ss:$0 sm:$0xff] }
  0xa2   : > { %v278_v35 = vsub.f32 %v936_v6, %v250_v19 }
  0xa6   : > { %v259_v20 = vpop.xlane.xlu0 %258 }
  0xa7   : > { %v260_v22 = vmul.f32 0.001953125, %v259_v20 }
  0xa9   : > { %v262_v23 = vsub.f32 %v260_v22, %v261_v21 }
  0xab   : > { %v263_v24 = vmax.f32 %v262_v23, 0.0 }
  0xad   : > { %v264_v25 = vadd.f32 1e-05, %v263_v24 }
  0xaf   : > { %646 = vrsqrt.f32 %v264_v25  ;;  %vm271_vm1 = vweird.f32 %v264_v25 }
  0xb5   : > { %v647_v26 = vpop.eup %646 }
  0xb6   : > { %v266_v27 = vmul.f32 %v647_v26, %v264_v25  ;;  %vm272_vm0 = vweird.f32 %v647_v26 }
  0xb7   : > { %vm273_vm2 = vmor %vm271_vm1, %vm272_vm0 }
  0xb8   : > { %v267_v28 = vmul.f32 %v647_v26, %v266_v27 }
  0xba   : > { %v268_v29 = vmul.f32 0.5, %v267_v28 }
  0xbc   : > { %v269_v30 = vsub.f32 1.5, %v268_v29 }
  0xbe   : > { %v270_v31 = vmul.f32 %v647_v26, %v269_v30 }
  0xc0   : > { %v274_v36 = vsel %vm273_vm2, %v647_v26, %v270_v31 }
  0xc1   : > { %v279_v37 = vmul.f32 %v275_v32, %v274_v36  ;;  %v280_v38 = vmul.f32 %v276_v33, %v274_v36  ;;  %v281_v39 = vmul.f32 %v277_v34, %v274_v36  ;;  %v282_v40 = vmul.f32 %v278_v35, %v274_v36 }
  0xc3   : > { %367 = vmatmul.f32.vlgmr.msra.gmra.mxu0 %v279_v37  ;;  %387 = vmatmul.f32.vlgmr.msra.gmra.mxu1 %v280_v38 }
  0xc4   : > { %407 = vmatmul.f32.vlgmr.msra.gmra.mxu2 %v281_v39  ;;  %427 = vmatmul.f32.vlgmr.msra.gmra.mxu3 %v282_v40 }
 0x140   : > { %v368_v41 = vpop.f32.mrf.mxu0  ;;  %v388_v2 = vpop.f32.mrf.mxu1 }
 0x141   : > { %v369_v1 = vadd.f32 %v645_v0, %v368_v41 }
 0x143   : > { %v389_v6 = vadd.f32 %v388_v2, %v369_v1 }
 0x147   : > { %v408_v42 = vpop.f32.mrf.mxu2  ;;  %v428_v44 = vpop.f32.mrf.mxu3 }
 0x148   : > { %v409_v43 = vadd.f32 %v408_v42, %v389_v6 }
 0x14a   : > { %v429_v45 = vadd.f32 %v428_v44, %v409_v43 }
 0x14c   : > { %431 = vst [vmem:[%s237_s22] sm:$0xff] %v429_v45 }
 0x14d   : > { %735 = shalt.err (!%p732_p13)
}
 0x14e   : > { %576 = dma.vmem_to_hbm [thread:$0]  (%p890_p4), %s447_s18, 128, %s449_s24, %s433_s25  }
 0x14f PF: > { %s460_s28 = sand.u32 1, %s774_s12   ;;  %p587_p0 = pnand %p557_p6, %p898_p7 }
 0x150   : > { %s461_s23 = scalar_lea.sflag [#allocation4], %s460_s28 }
 0x151   : > { %p588_p2 = pneg %p587_p0 }
 0x153   : > { %769 = dma.done.wait (%p588_p2), %s461_s23, 128  }
 0x154   : > { %771 = vsyncadd (%p588_p2), %s461_s23, 4294967168  ;;  %s20_s17 = sadd.s32 1, %s794_s17   ;;  %s1000_s12 = smov %s778_s13 }
 0x155   : > { %p17_p5 = scmp.ge.s32.totalorder %s20_s17, 4   ;;  %s1001_s13 = smov %s782_s14 }
 0x156   : > { %s1002_s14 = smov %s896_s8  ;;  %s1003_s15 = smov %s790_s16 }
 0x157   : > { %s1004_s16 = smov %s1006_s29  ;;  %19 = sbr.rel (!%p17_p5) target bundleno = 7 (0x7), region = 85 }
 0x15c   :  { %467 = vsyncpa [#allocation3], 1 }
 0x15d   :  { %469 = vsyncpa [#allocation3 + $0x1], 1 }
 0x15e   :  { %470 = vsyncpa [#allocation6], 1 }
 0x15f   :  { %471 = vsyncpa [#allocation4], 1 }
 0x160   :  { %473 = vsyncpa [#allocation4 + $0x1], 1 }

</bundles_post_ra>
